<compile_context>
chip_gen: v7x
topology: tpu7x:2x2x1
jax: 0.10.0
libtpu: 0.0.40
codegen_flags: <defaults>
</compile_context>

<pallas_src>
import functools

import jax
import jax.numpy as jnp
from jax.experimental import pallas as pl
from jax.experimental.pallas import tpu as pltpu


def _round_up(x, m):
    return (x + m - 1) // m * m


def _next_pow2(x):
    return 1 << max(0, (int(x) - 1).bit_length())


# ----------------------------------------------------------------------------
# Fused conv-chain kernel (conv -> bias -> [InstanceNorm] -> [LeakyReLU]) x n
# ----------------------------------------------------------------------------
def _make_chain_kernel(cfgs, *, N, Hcan, Wcan, M):
    """Build a kernel that runs a chain of convs on a shared flattened canvas.

    refs layout: x_canvas, (w_k, b_k) * nl, o_k * nl, canvas_scratch * (nl-1)
      x_canvas : (M + 4*Wcan, Cin0)        bf16
      w_k      : (kh, kw, Cin_k, CoutP_k)  bf16
      b_k      : (1, CoutP_k)              f32
      o_k      : (M, CoutP_k)              f32  (dense canvas output, wrapper slices)
      scratch k: (M + 4*Wcan, CoutP_k)     bf16 (next layer's input canvas)
    """
    HWcan = Hcan * Wcan
    nl = len(cfgs)

    def kernel(*refs):
        w_refs = [refs[1 + 2 * k] for k in range(nl)]
        b_refs = [refs[2 + 2 * k] for k in range(nl)]
        o_refs = list(refs[1 + 2 * nl:1 + 3 * nl])
        c_refs = list(refs[1 + 3 * nl:])

        # Canvas-position decomposition built once from an iota; Wcan is a power of
        # two so only bitwise/compare ops are needed (no integer div/mod).
        pos = jax.lax.broadcasted_iota(jnp.int32, (M, 1), 0)
        col = jnp.bitwise_and(pos, Wcan - 1)
        rowbase = pos - col                      # == (n * Hcan + i) * Wcan

        cur = refs[0]
        for k, cfg in enumerate(cfgs):
            kh, kw, cout_p = cfg["kh"], cfg["kw"], cfg["cout_p"]
            ho, wo = cfg["Ho"], cfg["Wo"]

            # Conv: one contiguous shifted-window slice + one MXU matmul per tap,
            # accumulated in f32, covering the whole batch (M = N*Hcan*Wcan rows).
            acc = jnp.zeros((M, cout_p), jnp.float32)
            for a in range(kh):
                for b in range(kw):
                    sh = a * Wcan + b
                    win = cur[sh:sh + M, :]
                    acc = acc + jnp.dot(win, w_refs[k][a, b],
                                        preferred_element_type=jnp.float32)
            y = acc + b_refs[k][...]

            # Per-sample validity masks for this layer's (Ho, Wo) output region.
            colmask = col < wo
            smasks = []
            for n in range(N):
                rm = jnp.logical_and(rowbase >= n * HWcan,
                                     rowbase < n * HWcan + ho * Wcan)
                smasks.append(jnp.logical_and(rm, colmask).astype(jnp.float32))

            if cfg["norm"]:
                # InstanceNorm2d(affine=False): masked one-pass stats per
                # (sample, channel), biased variance, eps=1e-5.
                inv_cnt = 1.0 / float(ho * wo)
                mean_b = jnp.zeros((M, cout_p), jnp.float32)
                rstd_b = jnp.zeros((M, cout_p), jnp.float32)
                for mn in smasks:
                    ym = y * mn
                    mu = jnp.sum(ym, axis=0, keepdims=True) * inv_cnt
                    ex2 = jnp.sum(ym * ym, axis=0, keepdims=True) * inv_cnt
                    var = jnp.maximum(ex2 - mu * mu, 0.0)
                    rs = jax.lax.rsqrt(var + 1e-5)
                    mean_b = mean_b + mn * mu
                    rstd_b = rstd_b + mn * rs
                y = (y - mean_b) * rstd_b

            if cfg["act"]:
                y = jnp.where(y > 0, y, 0.2 * y)      # LeakyReLU(0.2)

            o_refs[k][...] = y                        # lane-dense, 8-aligned f32 store

            if k + 1 < nl:
                # Hand the masked activation to the next layer entirely in VMEM:
                # shifting the flattened canvas by 2*Wcan+2 rows re-pads it by 2 px.
                mask = smasks[0]
                for mn in smasks[1:]:
                    mask = mask + mn
                cref = c_refs[k]
                cref[...] = jnp.zeros(cref.shape, cref.dtype)
                cref[2 * Wcan + 2:2 * Wcan + 2 + M, :] = (y * mask).astype(cref.dtype)
                cur = cref

    return kernel


def conv_chain(x, layers):
    """Run a fused chain of Conv(4x4, pad=2) layers (stride 2 only allowed first).

    x      : (N, H, W, Cin) NHWC float array.
    layers : list of dicts {w:(4,4,cin,cout), b:(cout,), stride, norm, act}.
    Returns the list of per-layer feature maps (N, Ho_k, Wo_k, Cout_k) float32.
    """
    N, H, W, Cin = x.shape
    nl = len(layers)
    assert layers[0]["stride"] in (1, 2)
    assert all(lp["stride"] == 1 for lp in layers[1:])

    # Per-layer output geometry (k=4, pad=2).
    geo = []
    h, w_sp = H, W
    for lp in layers:
        s = lp["stride"]
        ho = (h + 4 - 4) // s + 1
        wo = (w_sp + 4 - 4) // s + 1
        geo.append((ho, wo))
        h, w_sp = ho, wo

    # Shared canvas size for the whole chain.
    req_h, req_w = [], []
    if layers[0]["stride"] == 2:
        req_h.append(geo[0][0] + 1)
        req_w.append(geo[0][1] + 1)
    else:
        req_h.append(geo[0][0] + 3)
        req_w.append(geo[0][1] + 3)
    for k in range(1, nl):
        req_h.append(geo[k][0] + 3)
        req_w.append(geo[k][1] + 3)
    Hcan = max(req_h)
    Wcan = max(8, _next_pow2(max(req_w)))     # power of two & multiple of 8
    M = N * Hcan * Wcan                        # multiple of 8
    TAIL = 4 * Wcan                            # zero tail so tap slices never go OOB

    # First-layer input canvas (stride-2 is folded to stride-1 via space-to-depth).
    xb = x.astype(jnp.bfloat16)
    if layers[0]["stride"] == 2:
        ho0, wo0 = geo[0]
        xp = jnp.pad(xb, ((0, 0), (2, 2), (2, 2), (0, 0)))
        hc, wc = 2 * ho0 + 2, 2 * wo0 + 2
        xp = xp[:, :hc, :wc, :]
        xs = xp.reshape(N, ho0 + 1, 2, wo0 + 1, 2, Cin)
        xs = xs.transpose(0, 1, 3, 2, 4, 5).reshape(N, ho0 + 1, wo0 + 1, 4 * Cin)
        c0 = 4 * Cin
        hin, win = ho0 + 1, wo0 + 1
    else:
        xs = jnp.pad(xb, ((0, 0), (2, 2), (2, 2), (0, 0)))
        c0 = Cin
        hin, win = H + 4, W + 4
    canvas = jnp.pad(xs, ((0, 0), (0, Hcan - hin), (0, Wcan - win), (0, 0)))
    x_flat = jnp.pad(canvas.reshape(N * Hcan * Wcan, c0), ((0, TAIL), (0, 0)))

    # Layer params: bf16 weights, Cin padded to the previous layer's padded Cout,
    # Cout padded to a lane-dense multiple of 128 (sliced back in the wrapper).
    cfgs = []
    flat_inputs = [x_flat]
    cprev = c0
    for k, lp in enumerate(layers):
        wgt, bias = lp["w"], lp["b"]
        _, _, cin, cout = wgt.shape
        if k == 0 and lp["stride"] == 2:
            wgt = wgt.reshape(2, 2, 2, 2, cin, cout)
            wgt = wgt.transpose(0, 2, 1, 3, 4, 5).reshape(2, 2, 4 * cin, cout)
            kh, kw, cin = 2, 2, 4 * cin
        else:
            kh, kw = 4, 4
        if cin < cprev:
            wgt = jnp.pad(wgt, ((0, 0), (0, 0), (0, cprev - cin), (0, 0)))
        cout_p = max(128, _round_up(cout, 128))
        if cout_p != cout:
            wgt = jnp.pad(wgt, ((0, 0), (0, 0), (0, 0), (0, cout_p - cout)))
            bias = jnp.pad(bias, ((0, cout_p - cout),))
        flat_inputs.append(wgt.astype(jnp.bfloat16))
        flat_inputs.append(bias.reshape(1, cout_p).astype(jnp.float32))
        cfgs.append(dict(kh=kh, kw=kw, cin_p=cprev, cout_p=cout_p,
                         Ho=geo[k][0], Wo=geo[k][1], Cout=cout,
                         norm=lp["norm"], act=lp["act"]))
        cprev = cout_p

    kernel = _make_chain_kernel(cfgs, N=N, Hcan=Hcan, Wcan=Wcan, M=M)
    out_shape = tuple(jax.ShapeDtypeStruct((M, c["cout_p"]), jnp.float32) for c in cfgs)
    scratch = [pltpu.VMEM((M + TAIL, cfgs[k]["cout_p"]), jnp.bfloat16)
               for k in range(nl - 1)]

    flops = sum(2 * M * c["kh"] * c["kw"] * c["cin_p"] * c["cout_p"] for c in cfgs)
    trans = sum(N * c["cout_p"] for c in cfgs if c["norm"])
    in_bytes = sum(int(a.size) * a.dtype.itemsize for a in flat_inputs)
    out_bytes = sum(M * c["cout_p"] * 4 for c in cfgs)
    cost = pl.CostEstimate(flops=int(flops), transcendentals=int(trans),
                           bytes_accessed=int(in_bytes + out_bytes))

    outs = pl.pallas_call(
        kernel,
        out_shape=out_shape,
        scratch_shapes=scratch,
        compiler_params=pltpu.CompilerParams(vmem_limit_bytes=32 * 1024 * 1024),
        cost_estimate=cost,
    )(*flat_inputs)

    feats = []
    for k, c in enumerate(cfgs):
        o = outs[k].reshape(N, Hcan, Wcan, c["cout_p"])
        feats.append(o[:, :c["Ho"], :c["Wo"], :c["Cout"]])
    return feats


# ----------------------------------------------------------------------------
# AvgPool2d(3, stride=2, padding=1, count_include_pad=False)
# ----------------------------------------------------------------------------
def _avgpool_kernel(planes_ref, inv_ref, o_ref, *, Wfp, M):
    c = planes_ref.shape[-1]
    acc = jnp.zeros((M, c), jnp.float32)
    for a in range(3):
        for b in range(3):
            pa, da = a % 2, a // 2
            pb, db = b % 2, b // 2
            sh = da * Wfp + db
            acc = acc + planes_ref[2 * pa + pb, sh:sh + M, :].astype(jnp.float32)
    o_ref[...] = (acc * inv_ref[...]).astype(o_ref.dtype)


def avgpool3x3_s2(x):
    """AvgPool2d(kernel=3, stride=2, padding=1, count_include_pad=False).  NHWC."""
    N, H, W, C = x.shape
    Ho = (H - 1) // 2 + 1
    Wo = (W - 1) // 2 + 1
    Hf = Ho + 1
    Wfp = _round_up(Wo + 1, 8)

    # Fold the padded input once into 2x2 parity planes (no 9x HBM blow-up); the
    # 9 pool taps then become contiguous shifted row-slices inside the kernel.
    xpad = jnp.pad(x.astype(jnp.bfloat16),
                   ((0, 0), (1, 2 * Hf - H - 1), (1, 2 * Wfp - W - 1), (0, 0)))
    planes = xpad.reshape(N, Hf, 2, Wfp, 2, C)
    planes = planes.transpose(2, 4, 0, 1, 3, 5).reshape(4, N * Hf * Wfp, C)
    M = N * Hf * Wfp
    TAIL = 2 * Wfp
    planes = jnp.pad(planes, ((0, 0), (0, TAIL), (0, 0)))

    # 1 / valid-tap-count per output position (count_include_pad=False semantics).
    i_idx = jnp.arange(Hf, dtype=jnp.int32)
    j_idx = jnp.arange(Wfp, dtype=jnp.int32)
    cnt_i = jnp.clip(jnp.minimum(2 * i_idx + 1, H - 1)
                     - jnp.maximum(2 * i_idx - 1, 0) + 1, 1, 3)
    cnt_j = jnp.clip(jnp.minimum(2 * j_idx + 1, W - 1)
                     - jnp.maximum(2 * j_idx - 1, 0) + 1, 1, 3)
    inv2d = 1.0 / (cnt_i[:, None] * cnt_j[None, :]).astype(jnp.float32)
    inv = jnp.tile(inv2d.reshape(1, Hf * Wfp), (N, 1)).reshape(M, 1)

    cost = pl.CostEstimate(
        flops=int(10 * M * C), transcendentals=0,
        bytes_accessed=int(planes.size * 2 + inv.size * 4 + M * C * 2))

    out = pl.pallas_call(
        functools.partial(_avgpool_kernel, Wfp=Wfp, M=M),
        out_shape=jax.ShapeDtypeStruct((M, C), jnp.bfloat16),
        compiler_params=pltpu.CompilerParams(vmem_limit_bytes=32 * 1024 * 1024),
        cost_estimate=cost,
    )(planes, inv)
    return out.reshape(N, Hf, Wfp, C)[:, :Ho, :Wo, :]


# ----------------------------------------------------------------------------
# Parameter construction (deterministic) mirroring pix2pixHD NLayerDiscriminator
# ----------------------------------------------------------------------------
def build_nlayer_params(key, input_nc, ndf, n_layers):
    """Conv(k4,s2,p2)+LReLU, (n_layers-1)x [Conv s2+Norm+LReLU],
    Conv s1+Norm+LReLU, Conv s1 -> 1 channel.  getIntermFeat=True."""
    specs = [(input_nc, ndf, 2, False, True)]
    nf = ndf
    for _ in range(1, n_layers):
        nf_prev, nf = nf, min(nf * 2, 512)
        specs.append((nf_prev, nf, 2, True, True))
    nf_prev, nf = nf, min(nf * 2, 512)
    specs.append((nf_prev, nf, 1, True, True))
    specs.append((nf, 1, 1, False, False))

    params = []
    for (cin, cout, stride, norm, act) in specs:
        key, k1 = jax.random.split(key)
        w = 0.02 * jax.random.normal(k1, (4, 4, cin, cout), dtype=jnp.float32)
        b = jnp.zeros((cout,), dtype=jnp.float32)
        params.append(dict(w=w, b=b, stride=stride, norm=norm, act=act))
    return params, key


def build_multiscale_params(key, input_nc, ndf, num_D, n_layers):
    scales = []
    for _ in range(num_D):
        p, key = build_nlayer_params(key, input_nc, ndf, n_layers)
        scales.append(p)
    return scales, key


# ----------------------------------------------------------------------------
# Forward passes
# ----------------------------------------------------------------------------
def nlayer_forward(x, layer_params):
    """Returns all intermediate features (getIntermFeat=True semantics).  NHWC.

    The layer stack is split into fused chains; a stride-2 layer can only start a
    chain (its space-to-depth fold happens in the JAX glue between chains)."""
    chains, cur = [], []
    for lp in layer_params:
        if lp["stride"] == 2 and cur:
            chains.append(cur)
            cur = []
        cur.append(lp)
    chains.append(cur)

    feats = []
    h = x
    for ch in chains:
        outs = conv_chain(h, ch)
        feats.extend(outs)
        h = outs[-1]
    return feats


def multiscale_forward(x, scales_params):
    num_D = len(scales_params)
    result = []
    x_down = x
    for i in range(num_D):
        result.append(nlayer_forward(x_down, scales_params[num_D - 1 - i]))
        if i != num_D - 1:
            x_down = avgpool3x3_s2(x_down)
    return result


def whole_discriminator_forward(x_nchw, fine_params, coarse_params, fine_level):
    x = jnp.transpose(x_nchw, (0, 2, 3, 1))        # NCHW -> NHWC
    if fine_level:
        return multiscale_forward(x, fine_params)
    return multiscale_forward(x, coarse_params)


# ----------------------------------------------------------------------------
if __name__ == "__main__":
    key = jax.random.PRNGKey(0)

    # Config: norm_layer=InstanceNorm2d(affine=False), num_D=2, num_D_small=1,
    #         n_layers=2, n_layers_small=1
    key, kf, kc, kx = jax.random.split(key, 4)
    fine_params, _ = build_multiscale_params(kf, input_nc=4, ndf=64, num_D=2, n_layers=2)
    coarse_params, _ = build_multiscale_params(kc, input_nc=4, ndf=32, num_D=1, n_layers=1)

    # PyTorch-style NCHW input: batch=2, channels=4, spatial=16x16
    X = jax.random.normal(kx, (2, 4, 16, 16), dtype=jnp.float32)

    # fine_level = True branch
    fine_feats = whole_discriminator_forward(X, fine_params, coarse_params, fine_level=True)
    # fine_level = False branch
    coarse_feats = whole_discriminator_forward(X, fine_params, coarse_params, fine_level=False)

    jax.block_until_ready(jax.tree_util.tree_leaves(fine_feats))
    jax.block_until_ready(jax.tree_util.tree_leaves(coarse_feats))
    print("KERNEL_OK")
</pallas_src>

<mosaic_0001>
module attributes {stable_mosaic.version = 11 : i64} {
  func.func @kernel(%arg0: memref<384x16xbf16, #tpu.memory_space<vmem>>, %arg1: memref<2x2x16x128xbf16, #tpu.memory_space<vmem>>, %arg2: memref<1x128xf32, #tpu.memory_space<vmem>>, %arg3: memref<320x128xf32, #tpu.memory_space<vmem>>) attributes {dimension_semantics = [], scalar_prefetch = 0 : i64, scratch_operands = 0 : i64, tpu.core_type = #tpu.core_type<tc>} {
    %cst = arith.constant 0.000000e+00 : f32
    %0 = vector.broadcast %cst : f32 to vector<320x128xf32>
    %c0 = arith.constant 0 : index
    %c0_0 = arith.constant 0 : index
    %1 = vector.load %arg0[%c0, %c0_0] : memref<384x16xbf16, #tpu.memory_space<vmem>>, vector<320x16xbf16>
    %c0_1 = arith.constant 0 : index
    %c0_2 = arith.constant 0 : index
    %c0_3 = arith.constant 0 : index
    %c0_4 = arith.constant 0 : index
    %2 = vector.load %arg1[%c0_1, %c0_2, %c0_3, %c0_4] : memref<2x2x16x128xbf16, #tpu.memory_space<vmem>>, vector<1x1x16x128xbf16>
    %3 = vector.shape_cast %2 : vector<1x1x16x128xbf16> to vector<16x128xbf16>
    %cst_5 = arith.constant dense<0.000000e+00> : vector<320x128xf32>
    %4 = tpu.matmul %1, %3, %cst_5 {dimension_numbers = #tpu.dot_dimension_numbers<[1], [0], [0], [1], [0, 0, 1, 1], [], []>} : vector<320x16xbf16>, vector<16x128xbf16>, vector<320x128xf32> -> vector<320x128xf32>
    %5 = arith.addf %0, %4 : vector<320x128xf32>
    %c1 = arith.constant 1 : index
    %c0_6 = arith.constant 0 : index
    %6 = vector.load %arg0[%c1, %c0_6] : memref<384x16xbf16, #tpu.memory_space<vmem>>, vector<320x16xbf16>
    %c0_7 = arith.constant 0 : index
    %c1_8 = arith.constant 1 : index
    %c0_9 = arith.constant 0 : index
    %c0_10 = arith.constant 0 : index
    %7 = vector.load %arg1[%c0_7, %c1_8, %c0_9, %c0_10] : memref<2x2x16x128xbf16, #tpu.memory_space<vmem>>, vector<1x1x16x128xbf16>
    %8 = vector.shape_cast %7 : vector<1x1x16x128xbf16> to vector<16x128xbf16>
    %cst_11 = arith.constant dense<0.000000e+00> : vector<320x128xf32>
    %9 = tpu.matmul %6, %8, %cst_11 {dimension_numbers = #tpu.dot_dimension_numbers<[1], [0], [0], [1], [0, 0, 1, 1], [], []>} : vector<320x16xbf16>, vector<16x128xbf16>, vector<320x128xf32> -> vector<320x128xf32>
    %10 = arith.addf %5, %9 : vector<320x128xf32>
    %c16 = arith.constant 16 : index
    %c0_12 = arith.constant 0 : index
    %11 = vector.load %arg0[%c16, %c0_12] : memref<384x16xbf16, #tpu.memory_space<vmem>>, vector<320x16xbf16>
    %c1_13 = arith.constant 1 : index
    %c0_14 = arith.constant 0 : index
    %c0_15 = arith.constant 0 : index
    %c0_16 = arith.constant 0 : index
    %12 = vector.load %arg1[%c1_13, %c0_14, %c0_15, %c0_16] : memref<2x2x16x128xbf16, #tpu.memory_space<vmem>>, vector<1x1x16x128xbf16>
    %13 = vector.shape_cast %12 : vector<1x1x16x128xbf16> to vector<16x128xbf16>
    %cst_17 = arith.constant dense<0.000000e+00> : vector<320x128xf32>
    %14 = tpu.matmul %11, %13, %cst_17 {dimension_numbers = #tpu.dot_dimension_numbers<[1], [0], [0], [1], [0, 0, 1, 1], [], []>} : vector<320x16xbf16>, vector<16x128xbf16>, vector<320x128xf32> -> vector<320x128xf32>
    %15 = arith.addf %10, %14 : vector<320x128xf32>
    %c17 = arith.constant 17 : index
    %c0_18 = arith.constant 0 : index
    %16 = vector.load %arg0[%c17, %c0_18] : memref<384x16xbf16, #tpu.memory_space<vmem>>, vector<320x16xbf16>
    %c1_19 = arith.constant 1 : index
    %c1_20 = arith.constant 1 : index
    %c0_21 = arith.constant 0 : index
    %c0_22 = arith.constant 0 : index
    %17 = vector.load %arg1[%c1_19, %c1_20, %c0_21, %c0_22] : memref<2x2x16x128xbf16, #tpu.memory_space<vmem>>, vector<1x1x16x128xbf16>
    %18 = vector.shape_cast %17 : vector<1x1x16x128xbf16> to vector<16x128xbf16>
    %cst_23 = arith.constant dense<0.000000e+00> : vector<320x128xf32>
    %19 = tpu.matmul %16, %18, %cst_23 {dimension_numbers = #tpu.dot_dimension_numbers<[1], [0], [0], [1], [0, 0, 1, 1], [], []>} : vector<320x16xbf16>, vector<16x128xbf16>, vector<320x128xf32> -> vector<320x128xf32>
    %20 = arith.addf %15, %19 : vector<320x128xf32>
    %c0_24 = arith.constant 0 : index
    %c0_25 = arith.constant 0 : index
    %21 = vector.load %arg2[%c0_24, %c0_25] : memref<1x128xf32, #tpu.memory_space<vmem>>, vector<1x128xf32>
    %22 = vector.broadcast %21 : vector<1x128xf32> to vector<320x128xf32>
    %23 = arith.addf %20, %22 : vector<320x128xf32>
    %cst_26 = arith.constant 0.000000e+00 : f32
    %24 = vector.broadcast %cst_26 : f32 to vector<320x128xf32>
    %25 = arith.cmpf ogt, %23, %24 : vector<320x128xf32>
    %cst_27 = arith.constant 2.000000e-01 : f32
    %26 = vector.broadcast %cst_27 : f32 to vector<320x128xf32>
    %27 = arith.mulf %26, %23 : vector<320x128xf32>
    %28 = arith.select %25, %23, %27 : vector<320x128xi1>, vector<320x128xf32>
    %c0_28 = arith.constant 0 : index
    %c0_29 = arith.constant 0 : index
    %29 = vector.load %arg3[%c0_28, %c0_29] : memref<320x128xf32, #tpu.memory_space<vmem>>, vector<320x128xf32>
    tpu.vector_store %arg3[%c0_28, %c0_29], %28 {strides = array<i32>} : memref<320x128xf32, #tpu.memory_space<vmem>>, vector<320x128xf32>,
    return
  }
}

</mosaic_0001>

<bundles_post_ra>
// kernel: tpu_custom_call.1
= control target key start
LH: loop header
LB: loop body
LE: loop exit
PB: predicated region body
PF: predicated region fallthrough
CT: control target
= control target key end

     0   :  { %vm336_vm0 = vcmask 130048   ;;  %vm165_vm1 = vsmask.f32 7424  ;;  %s3220_s0 = inlined_call_operand.vmem [shape: bf16[384,16], index: 0, kind: input, shape index: {}]   ;;  %s3221_s1 = inlined_call_operand.vmem [shape: bf16[2,2,16,128], index: 1, kind: input, shape index: {}]   ;;  %s3222_s2 = inlined_call_operand.vmem [shape: f32[1,128], index: 2, kind: input, shape index: {}]   ;;  %s3223_s3 = inlined_call_operand.hbm [shape: f32[320,128], index: 3, kind: output, shape index: {}]  }
   0x1   :  { %v2632_v0 = vld [vmem:[%s3221_s1 + $0x10] sm:$0xff]   ;;  %v2633_v1 = vld [vmem:[%s3221_s1 + $0x8] sm:$0xff]   ;;  %v2761_v4 = vld [vmem:[%s3220_s0] sm:$0xff]  }
   0x2   :  { %2425 = vmatprep.subr.bf16.mxu0 %v2632_v0  ;;  %v2634_v2 = vld [vmem:[%s3220_s0 + $0x8] sm:$0xff]   ;;  %2341 = vmatprep.subr.bf16.mxu1 %v2633_v1  ;;  %v2635_v3 = vld [vmem:[%s3220_s0 + $0x10] sm:$0xff]   ;;  %v2638_v6 = vld [vmem:[%s3221_s1] sm:$0xff]   ;;  %v167_v7 = vshrl.u32 %v2761_v4, 16  ;;  %v169_v8 = vshll.u32 %v2761_v4, 16 }
   0x3   :  { %2426 = vmatpush3.bf16.msra.mxu0 %v2632_v0  ;;  %2427 = vmatprep.mubr.msk.bf16.mxu0 %vm336_vm0, %v2634_v2  ;;  %v2766_v5 = vld [vmem:[%s3220_s0 + $0x8] sm:$0xff]   ;;  %v2639_v11 = vld [vmem:[%s3221_s1 + $0x18] sm:$0xff]   ;;  %v2782_v14 = vld [vmem:[%s3220_s0 + $0x10] sm:$0xff]  }
   0x4   :  { %2342 = vmatpush3.bf16.msra.mxu1 %v2633_v1  ;;  %v174_v9 = vshll.u32 %v2766_v5, 16  ;;  %v178_v10 = vshrl.u32 %v2766_v5, 16  ;;  %v171_v12 = vrot.slane %v169_v8, 1  ;;  %v2641_v15 = vld [vmem:[%s3220_s0 + $0x18] sm:$0xff]   ;;  %2467 = vmatprep.subr.bf16.mxu0 %v2639_v11  ;;  %v182_v18 = vshll.u32 %v2782_v14, 16  ;;  %v2642_v19 = vld [vmem:[%s3220_s0 + $0x20] sm:$0xff]  }
   0x5   :  { %2383 = vmatprep.subr.bf16.mxu1 %v2638_v6  ;;  %v2795_v20 = vld [vmem:[%s3220_s0 + $0x18] sm:$0xff]   ;;  %v186_v21 = vshrl.u32 %v2782_v14, 16  ;;  %v2802_v24 = vld [vmem:[%s3220_s0 + $0x20] sm:$0xff]   ;;  %v2645_v27 = vld [vmem:[%s3220_s0 + $0x28] sm:$0xff]  }
   0x6   :  { %2428 = vmatmul.mubr.msk.bf16.vlgmr.msra.gmra.mrb[0].mxu0 %vm336_vm0, %v2635_v3  ;;  %v176_v13 = vrot.slane %v174_v9, 1  ;;  %v172_v16 = vor.u32 %v171_v12, %v167_v7  ;;  %v184_v23 = vrot.slane %v182_v18, 1  ;;  %v190_v25 = vshll.u32 %v2795_v20, 16  ;;  %v2816_v31 = vld [vmem:[%s3220_s0 + $0x28] sm:$0xff]   ;;  %v2646_v33 = vld [vmem:[%s3220_s0 + $0x30] sm:$0xff]   ;;  %v2649_v42 = vld [vmem:[%s3220_s0 + $0x38] sm:$0xff]  }
   0x7   :  { %2468 = vmatpush3.bf16.msra.mxu0 %v2639_v11  ;;  %2431 = vmatprep.mubr.msk.bf16.mxu0 %vm336_vm0, %v2641_v15  ;;  %v194_v26 = vshrl.u32 %v2795_v20, 16  ;;  %v198_v30 = vshll.u32 %v2802_v24, 16  ;;  %v202_v34 = vshrl.u32 %v2802_v24, 16  ;;  %v206_v36 = vshll.u32 %v2816_v31, 16  ;;  %v2829_v39 = vld [vmem:[%s3220_s0 + $0x30] sm:$0xff]   ;;  %v2841_v46 = vld [vmem:[%s3220_s0 + $0x38] sm:$0xff]  }
   0x8   :  { %v180_v17 = vor.u32 %v178_v10, %v176_v13  ;;  %v177_v22 = vsel %vm165_vm1, %v172_v16, %v176_v13  ;;  %v188_v29 = vor.u32 %v186_v21, %v184_v23  ;;  %v192_v32 = vrot.slane %v190_v25, 1  ;;  %v2852_v51 = vld [vmem:[%s3220_s0 + $0x40] sm:$0xff]   ;;  %v2861_v56 = vld [vmem:[%s3220_s0 + $0x48] sm:$0xff]   ;;  %v2878_v1 = vld [vmem:[%s3220_s0 + $0x50] sm:$0xff]  }
   0x9   :  { %2343 = vmatprep.mubr.msk.bf16.mxu1 %vm336_vm0, %v177_v22  ;;  %v200_v35 = vrot.slane %v198_v30, 1  ;;  %v208_v41 = vrot.slane %v206_v36, 1  ;;  %v214_v43 = vshll.u32 %v2829_v39, 16  ;;  %v210_v45 = vshrl.u32 %v2816_v31, 16  ;;  %v2650_v53 = vld [vmem:[%s3220_s0 + $0x40] sm:$0xff]   ;;  %v2653_v57 = vld [vmem:[%s3220_s0 + $0x48] sm:$0xff]  }
   0xa   :  { %v185_v28 = vsel %vm165_vm1, %v180_v17, %v184_v23  ;;  %v193_v37 = vsel %vm165_vm1, %v188_v29, %v192_v32  ;;  %v196_v38 = vor.u32 %v194_v26, %v192_v32  ;;  %v218_v48 = vshrl.u32 %v2829_v39, 16  ;;  %v2654_v3 = vld [vmem:[%s3220_s0 + $0x50] sm:$0xff]   ;;  %v2887_v8 = vld [vmem:[%s3220_s0 + $0x58] sm:$0xff]   ;;  %v2904_v18 = vld [vmem:[%s3220_s0 + $0x60] sm:$0xff]  }
   0xb   :  { %2344 = vmatmul.mubr.msk.bf16.vlgmr.msra.gmra.mrb[0].mxu1 %vm336_vm0, %v185_v28  ;;  %v204_v40 = vor.u32 %v202_v34, %v200_v35  ;;  %v222_v49 = vshll.u32 %v2841_v46, 16  ;;  %v216_v50 = vrot.slane %v214_v43, 1  ;;  %v212_v52 = vor.u32 %v210_v45, %v208_v41  ;;  %v2657_v9 = vld [vmem:[%s3220_s0 + $0x58] sm:$0xff]   ;;  %v2658_v21 = vld [vmem:[%s3220_s0 + $0x60] sm:$0xff]   ;;  %v2913_v25 = vld [vmem:[%s3220_s0 + $0x68] sm:$0xff]  }
   0xc   :  { %2384 = vmatpush3.bf16.msra.mxu1 %v2638_v6  ;;  %2347 = vmatprep.mubr.msk.bf16.mxu1 %vm336_vm0, %v193_v37  ;;  %v201_v44 = vsel %vm165_vm1, %v196_v38, %v200_v35  ;;  %v230_v58 = vshll.u32 %v2852_v51, 16  ;;  %v226_v60 = vshrl.u32 %v2841_v46, 16  ;;  %v234_v62 = vshrl.u32 %v2852_v51, 16  ;;  %v2661_v26 = vld [vmem:[%s3220_s0 + $0x68] sm:$0xff]   ;;  %v2930_v35 = vld [vmem:[%s3220_s0 + $0x70] sm:$0xff]  }
   0xd   :  { %v209_v47 = vsel %vm165_vm1, %v204_v40, %v208_v41  ;;  %v220_v54 = vor.u32 %v218_v48, %v216_v50  ;;  %v224_v55 = vrot.slane %v222_v49, 1  ;;  %v217_v59 = vsel %vm165_vm1, %v212_v52, %v216_v50  ;;  %v2662_v37 = vld [vmem:[%s3220_s0 + $0x70] sm:$0xff]   ;;  %v2939_v41 = vld [vmem:[%s3220_s0 + $0x78] sm:$0xff]   ;;  %v2955_v50 = vld [vmem:[%s3220_s0 + $0x80] sm:$0xff]  }
   0xe   :  { %2432 = vmatmul.mubr.msk.bf16.gmra.mrb[4].mxu0 %vm336_vm0, %v2642_v19  ;;  %v238_v63 = vshll.u32 %v2861_v56, 16  ;;  %v232_v0 = vrot.slane %v230_v58, 1  ;;  %v246_v10 = vshll.u32 %v2878_v1, 16  ;;  %v242_v12 = vshrl.u32 %v2861_v56, 16  ;;  %v2965_v58 = vld [vmem:[%s3220_s0 + $0x88] sm:$0xff]  }
   0xf   :  { %2435 = vmatprep.mubr.msk.bf16.mxu0 %vm336_vm0, %v2645_v27  ;;  %v225_v61 = vsel %vm165_vm1, %v220_v54, %v224_v55  ;;  %v228_v2 = vor.u32 %v226_v60, %v224_v55  ;;  %v250_v15 = vshrl.u32 %v2878_v1, 16  ;;  %v254_v16 = vshll.u32 %v2887_v8, 16  ;;  %v2666_v54 = vld [vmem:[%s3220_s0 + $0x80] sm:$0xff]   ;;  %v2669_v60 = vld [vmem:[%s3220_s0 + $0x88] sm:$0xff]  }
  0x10   :  { %v236_v6 = vor.u32 %v234_v62, %v232_v0  ;;  %v240_v7 = vrot.slane %v238_v63, 1  ;;  %v248_v17 = vrot.slane %v246_v10, 1  ;;  %v262_v27 = vshll.u32 %v2904_v18, 16 }
  0x11   :  { %v233_v11 = vsel %vm165_vm1, %v228_v2, %v232_v0  ;;  %v256_v23 = vrot.slane %v254_v16, 1  ;;  %v258_v29 = vshrl.u32 %v2887_v8, 16  ;;  %v266_v32 = vshrl.u32 %v2904_v18, 16  ;;  %v2997_v16 = vld [vmem:[%s3220_s0 + $0x98] sm:$0xff]  }
  0x12   :  { %v241_v13 = vsel %vm165_vm1, %v236_v6, %v240_v7  ;;  %v244_v19 = vor.u32 %v242_v12, %v240_v7  ;;  %v252_v22 = vor.u32 %v250_v15, %v248_v17  ;;  %v264_v34 = vrot.slane %v262_v27, 1  ;;  %v2984_v7 = vld [vmem:[%s3220_s0 + $0x90] sm:$0xff]  }
  0x13   :  { %2348 = vmatmul.mubr.msk.bf16.gmra.mrb[4].mxu1 %vm336_vm0, %v201_v44  ;;  %v260_v36 = vor.u32 %v258_v29, %v256_v23  ;;  %v278_v43 = vshll.u32 %v2930_v35, 16  ;;  %v274_v45 = vshrl.u32 %v2913_v25, 16  ;;  %v282_v48 = vshrl.u32 %v2930_v35, 16  ;;  %v2670_v12 = vld [vmem:[%s3220_s0 + $0x90] sm:$0xff]  }
  0x14   :  { %2351 = vmatprep.mubr.msk.bf16.mxu1 %vm336_vm0, %v209_v47  ;;  %v249_v28 = vsel %vm165_vm1, %v244_v19, %v248_v17  ;;  %v257_v30 = vsel %vm165_vm1, %v252_v22, %v256_v23  ;;  %v268_v38 = vor.u32 %v266_v32, %v264_v34  ;;  %v286_v49 = vshll.u32 %v2939_v41, 16  ;;  %v2673_v17 = vld [vmem:[%s3220_s0 + $0x98] sm:$0xff]  }
  0x15   :  { %v265_v44 = vsel %vm165_vm1, %v260_v36, %v264_v34  ;;  %v280_v52 = vrot.slane %v278_v43, 1  ;;  %v290_v63 = vshrl.u32 %v2939_v41, 16  ;;  %v298_v2 = vshrl.u32 %v2955_v50, 16  ;;  %v2679_v32 = vld [vmem:[%s3220_s0 + $0x18] sm:$0xff]  }
  0x16   :  { %2436 = vmatmul.mubr.msk.bf16.gmra.mrb[8].mxu0 %vm336_vm0, %v2646_v33  ;;  %v270_v33 = vshll.u32 %v2913_v25, 16  ;;  %v310_v19 = vshll.u32 %v2984_v7, 16  ;;  %v306_v27 = vshrl.u32 %v2965_v58, 16  ;;  %v314_v29 = vshrl.u32 %v2984_v7, 16 }
  0x17   :  { %2439 = vmatprep.mubr.msk.bf16.mxu0 %vm336_vm0, %v2649_v42  ;;  %v2665_v42 = vld [vmem:[%s3220_s0 + $0x78] sm:$0xff]   ;;  %v284_v55 = vor.u32 %v282_v48, %v280_v52 }
  0x18   :  { %v272_v40 = vrot.slane %v270_v33, 1  ;;  %v312_v33 = vrot.slane %v310_v19, 1 }
  0x1a   :  { %v273_v47 = vsel %vm165_vm1, %v268_v38, %v272_v40  ;;  %v316_v43 = vor.u32 %v314_v29, %v312_v33 }
  0x1b   :  { %2352 = vmatmul.mubr.msk.bf16.gmra.mrb[8].mxu1 %vm336_vm0, %v217_v59  ;;  %v294_v59 = vshll.u32 %v2955_v50, 16 }
  0x1c   :  { %2355 = vmatprep.mubr.msk.bf16.mxu1 %vm336_vm0, %v225_v61  ;;  %v2677_v61 = vld [vmem:[%s3220_s0 + $0x8] sm:$0xff]  }
  0x1d   :  { %v296_v6 = vrot.slane %v294_v59, 1  ;;  %v1421_v10 = vshll.u32 %v2677_v61, 16 }
  0x1e   :  { %2440 = vmatmul.mubr.msk.bf16.gmra.mrb[12].mxu0 %vm336_vm0, %v2650_v53  ;;  %v276_v53 = vor.u32 %v274_v45, %v272_v40  ;;  %v2674_v40 = vld [vmem:[%s3220_s0 + $0xa0] sm:$0xff]   ;;  %v1434_v45 = vshll.u32 %v2679_v32, 16 }
  0x1f   :  { %2443 = vmatprep.mubr.msk.bf16.mxu0 %vm336_vm0, %v2653_v57  ;;  %v288_v57 = vrot.slane %v286_v49, 1  ;;  %v1423_v22 = vrot.slane %v1421_v10, 1  ;;  %v1438_v49 = vshrl.u32 %v2679_v32, 16 }
  0x20   :  { %v281_v62 = vsel %vm165_vm1, %v276_v53, %v280_v52 }
  0x21   :  { %v289_v0 = vsel %vm165_vm1, %v284_v55, %v288_v57 }
  0x23   :  { %2356 = vmatmul.mubr.msk.bf16.gmra.mrb[12].mxu1 %vm336_vm0, %v233_v11  ;;  %v292_v11 = vor.u32 %v290_v63, %v288_v57 }
  0x24   :  { %2359 = vmatprep.mubr.msk.bf16.mxu1 %vm336_vm0, %v241_v13  ;;  %v300_v13 = vor.u32 %v298_v2, %v296_v6 }
  0x26   :  { %2444 = vmatmul.mubr.msk.bf16.gmra.mrb[16].mxu0 %vm336_vm0, %v2654_v3  ;;  %v302_v3 = vshll.u32 %v2965_v58, 16 }
  0x27   :  { %2447 = vmatprep.mubr.msk.bf16.mxu0 %vm336_vm0, %v2657_v9  ;;  %v2678_v9 = vld [vmem:[%s3220_s0 + $0x10] sm:$0xff]  }
  0x28   :  { %v304_v15 = vrot.slane %v302_v3, 1  ;;  %v1426_v23 = vshll.u32 %v2678_v9, 16 }
  0x2a   :  { %v1428_v36 = vrot.slane %v1426_v23, 1  ;;  %v308_v38 = vor.u32 %v306_v27, %v304_v15 }
  0x2b   :  { %2360 = vmatmul.mubr.msk.bf16.gmra.mrb[16].mxu1 %vm336_vm0, %v249_v28  ;;  %v305_v28 = vsel %vm165_vm1, %v300_v13, %v304_v15 }
  0x2c   :  { %2363 = vmatprep.mubr.msk.bf16.mxu1 %vm336_vm0, %v257_v30  ;;  %v318_v30 = vshll.u32 %v2997_v16, 16 }
  0x2e   :  { %2448 = vmatmul.mubr.msk.bf16.gmra.mrb[20].mxu0 %vm336_vm0, %v2658_v21  ;;  %v1419_v21 = vshrl.u32 %v2677_v61, 16 }
  0x2f   :  { %2451 = vmatprep.mubr.msk.bf16.mxu0 %vm336_vm0, %v2661_v26  ;;  %v297_v26 = vsel %vm165_vm1, %v292_v11, %v296_v6 }
  0x30   :  { %v1424_v34 = vor.u32 %v1423_v22, %v1419_v21 }
  0x32   :  { %v1429_v48 = vsel %vm165_vm1, %v1424_v34, %v1428_v36 }
  0x33   :  { %2364 = vmatmul.mubr.msk.bf16.gmra.mrb[20].mxu1 %vm336_vm0, %v265_v44  ;;  %v320_v44 = vrot.slane %v318_v30, 1 }
  0x34   :  { %2367 = vmatprep.mubr.msk.bf16.mxu1 %vm336_vm0, %v273_v47  ;;  %v1430_v47 = vshrl.u32 %v2678_v9, 16 }
  0x36   :  { %2452 = vmatmul.mubr.msk.bf16.gmra.mrb[24].mxu0 %vm336_vm0, %v2662_v37  ;;  %v2680_v37 = vld [vmem:[%s3220_s0 + $0x20] sm:$0xff]  }
  0x37   :  { %2455 = vmatprep.mubr.msk.bf16.mxu0 %vm336_vm0, %v2665_v42  ;;  %v2676_v42 = vld [vmem:[%s3220_s0 + $0xa0] ss:$0 sps:$4 sm:$0x11]   ;;  %v1442_v52 = vshll.u32 %v2680_v37, 16 }
  0x3b   :  { %2368 = vmatmul.mubr.msk.bf16.gmra.mrb[24].mxu1 %vm336_vm0, %v281_v62 }
  0x3c   :  { %2371 = vmatprep.mubr.msk.bf16.mxu1 %vm336_vm0, %v289_v0 }
  0x3e   :  { %2456 = vmatmul.mubr.msk.bf16.gmra.mrb[28].mxu0 %vm336_vm0, %v2666_v54 }
  0x3f   :  { %2459 = vmatprep.mubr.msk.bf16.mxu0 %vm336_vm0, %v2669_v60 }
  0x43   :  { %2372 = vmatmul.mubr.msk.bf16.gmra.mrb[28].mxu1 %vm336_vm0, %v297_v26 }
  0x44   :  { %2375 = vmatprep.mubr.msk.bf16.mxu1 %vm336_vm0, %v305_v28 }
  0x46   :  { %2460 = vmatmul.mubr.msk.bf16.gmra.mrb[32].mxu0 %vm336_vm0, %v2670_v12 }
  0x47   :  { %2463 = vmatprep.mubr.msk.bf16.mxu0 %vm336_vm0, %v2673_v17 }
  0x48   :  { %8 = vsyncpa [#allocation3], 0  ;;  %v313_v53 = vsel %vm165_vm1, %v308_v38, %v312_v33  ;;  %v322_v54 = vshrl.u32 %v2997_v16, 16  ;;  %v326_v55 = vshll.u32 %v2676_v42, 16  ;;  %v321_v57 = vsel %vm165_vm1, %v316_v43, %v320_v44  ;;  %v2681_v60 = vld [vmem:[%s3220_s0 + $0x28] sm:$0xff]   ;;  %v2682_v0 = vld [vmem:[%s3220_s0 + $0x30] sm:$0xff]  }
  0x49   :  { %v1436_v59 = vrot.slane %v1434_v45, 1  ;;  %v1432_v61 = vor.u32 %v1430_v47, %v1428_v36  ;;  %v1444_v63 = vrot.slane %v1442_v52, 1  ;;  %v1450_v6 = vshll.u32 %v2681_v60, 16  ;;  %v2683_v19 = vld [vmem:[%s3220_s0 + $0x38] sm:$0xff]   ;;  %v2684_v26 = vld [vmem:[%s3220_s0 + $0x40] sm:$0xff]   ;;  %v2685_v36 = vld [vmem:[%s3220_s0 + $0x48] sm:$0xff]  }
  0x4a   :  { %v324_v2 = vor.u32 %v322_v54, %v320_v44  ;;  %v328_v3 = vrot.slane %v326_v55, 1  ;;  %v1446_v10 = vshrl.u32 %v2680_v37, 16  ;;  %v1454_v12 = vshrl.u32 %v2681_v60, 16  ;;  %v2688_v54 = vld [vmem:[%s3220_s0 + $0x60] sm:$0xff]  }
  0x4b   :  { %2376 = vmatmul.mubr.msk.bf16.gmra.mrb[32].mxu1 %vm336_vm0, %v313_v53  ;;  %v1440_v62 = vor.u32 %v1438_v49, %v1436_v59  ;;  %v1437_v9 = vsel %vm165_vm1, %v1432_v61, %v1436_v59  ;;  %v1458_v13 = vshll.u32 %v2682_v0, 16  ;;  %v1452_v17 = vrot.slane %v1450_v6, 1  ;;  %v2687_v49 = vld [vmem:[%s3220_s0 + $0x58] sm:$0xff]  }
  0x4c   :  { %2379 = vmatprep.mubr.msk.bf16.mxu1 %vm336_vm0, %v321_v57  ;;  %v329_v15 = vsel %vm165_vm1, %v324_v2, %v328_v3  ;;  %v1448_v21 = vor.u32 %v1446_v10, %v1444_v63  ;;  %v1466_v27 = vshll.u32 %v2683_v19, 16  ;;  %v1462_v29 = vshrl.u32 %v2682_v0, 16  ;;  %v2690_v3 = vld [vmem:[%s3220_s0 + $0x70] sm:$0xff]  }
  0x4d   :  { %v1445_v11 = vsel %vm165_vm1, %v1440_v62, %v1444_v63  ;;  %v1456_v22 = vor.u32 %v1454_v12, %v1452_v17  ;;  %v1460_v23 = vrot.slane %v1458_v13, 1  ;;  %v1470_v32 = vshrl.u32 %v2683_v19, 16  ;;  %v2689_v63 = vld [vmem:[%s3220_s0 + $0x68] sm:$0xff]  }
  0x4e   :  { %2464 = vmatmul.mubr.msk.bf16.gmra.mrb[36].mxu0 %vm336_vm0, %v2674_v40  ;;  %v1453_v28 = vsel %vm165_vm1, %v1448_v21, %v1452_v17  ;;  %v1474_v33 = vshll.u32 %v2684_v26, 16  ;;  %v1468_v34 = vrot.slane %v1466_v27, 1  ;;  %v2686_v40 = vld [vmem:[%s3220_s0 + $0x50] sm:$0xff]   ;;  %v1482_v42 = vshll.u32 %v2685_v36, 16  ;;  %v2692_v21 = vld [vmem:[%s3220_s0 + $0x80] sm:$0xff]  }
  0x4f   :  { %2469 = vmatprep.mubr.msk.bf16.mxu0 %vm336_vm0, %v1429_v48  ;;  %v1461_v30 = vsel %vm165_vm1, %v1456_v22, %v1460_v23  ;;  %v1464_v37 = vor.u32 %v1462_v29, %v1460_v23  ;;  %v1478_v44 = vshrl.u32 %v2684_v26, 16  ;;  %v1486_v47 = vshrl.u32 %v2685_v36, 16 }
  0x50   :  { %v1476_v38 = vrot.slane %v1474_v33, 1  ;;  %v1490_v48 = vshll.u32 %v2686_v40, 16  ;;  %v1498_v55 = vshll.u32 %v2687_v49, 16  ;;  %v1494_v59 = vshrl.u32 %v2686_v40, 16 }
  0x51   :  { %v1469_v43 = vsel %vm165_vm1, %v1464_v37, %v1468_v34  ;;  %v1502_v61 = vshrl.u32 %v2687_v49, 16  ;;  %v1506_v62 = vshll.u32 %v2688_v54, 16  ;;  %v1514_v6 = vshll.u32 %v2689_v63, 16 }
  0x52   :  { %v1480_v52 = vor.u32 %v1478_v44, %v1476_v38  ;;  %v1492_v53 = vrot.slane %v1490_v48, 1  ;;  %v1510_v10 = vshrl.u32 %v2688_v54, 16  ;;  %v1518_v12 = vshrl.u32 %v2689_v63, 16 }
  0x53   :  { %2380 = vmatmul.mubr.msk.bf16.gmra.mrb[36].mxu1 %vm336_vm0, %v329_v15  ;;  %v1508_v2 = vrot.slane %v1506_v62, 1  ;;  %v1522_v13 = vshll.u32 %v2690_v3, 16  ;;  %v2691_v15 = vld [vmem:[%s3220_s0 + $0x78] sm:$0xff]   ;;  %v1526_v26 = vshrl.u32 %v2690_v3, 16  ;;  %v1538_v29 = vshll.u32 %v2692_v21, 16 }
  0x54   :  { %2385 = vmatprep.mubr.msk.bf16.mxu1 %vm336_vm0, %v2761_v4  ;;  %v1472_v4 = vor.u32 %v1470_v32, %v1468_v34  ;;  %v1496_v0 = vor.u32 %v1494_v59, %v1492_v53  ;;  %v1530_v22 = vshll.u32 %v2691_v15, 16  ;;  %v2694_v34 = vld [vmem:[%s3220_s0 + $0x90] sm:$0xff]  }
  0x55   :  { %v1512_v17 = vor.u32 %v1510_v10, %v1508_v2  ;;  %v1524_v19 = vrot.slane %v1522_v13, 1  ;;  %v1540_v33 = vrot.slane %v1538_v29, 1  ;;  %v1558_v49 = vshrl.u32 %v2694_v34, 16 }
  0x56   :  { %2470 = vmatmul.mubr.msk.bf16.vlgmr.msra.gmra.mrb[0].mxu0 %vm336_vm0, %v1437_v9  ;;  %v1477_v45 = vsel %vm165_vm1, %v1472_v4, %v1476_v38  ;;  %v1542_v4 = vshrl.u32 %v2692_v21, 16 }
  0x57   :  { %2473 = vmatprep.mubr.msk.bf16.mxu0 %vm336_vm0, %v1445_v11  ;;  %v1528_v32 = vor.u32 %v1526_v26, %v1524_v19 }
  0x58   :  { %v1544_v44 = vor.u32 %v1542_v4, %v1540_v33 }
  0x5b   :  { %2386 = vmatmul.mubr.msk.bf16.vlgmr.msra.gmra.mrb[0].mxu1 %vm336_vm0, %v2766_v5  ;;  %v1484_v5 = vrot.slane %v1482_v42, 1  ;;  %v1554_v42 = vshll.u32 %v2694_v34, 16 }
  0x5c   :  { %2389 = vmatprep.mubr.msk.bf16.mxu1 %vm336_vm0, %v2782_v14 }
  0x5d   :  { %v1488_v14 = vor.u32 %v1486_v47, %v1484_v5  ;;  %v1485_v57 = vsel %vm165_vm1, %v1480_v52, %v1484_v5  ;;  %v2696_v47 = vld [vmem:[%s3220_s0 + $0xa0] sm:$0xff]  }
  0x5e   :  { %2474 = vmatmul.mubr.msk.bf16.gmra.mrb[4].mxu0 %vm336_vm0, %v1453_v28  ;;  %v1534_v28 = vshrl.u32 %v2691_v15, 16 }
  0x5f   :  { %2477 = vmatprep.mubr.msk.bf16.mxu0 %vm336_vm0, %v1461_v30  ;;  %v1493_v60 = vsel %vm165_vm1, %v1488_v14, %v1492_v53  ;;  %v2693_v30 = vld [vmem:[%s3220_s0 + $0x88] sm:$0xff]   ;;  %v1570_v53 = vshll.u32 %v2696_v47, 16 }
  0x60   :  { %v1546_v36 = vshll.u32 %v2693_v30, 16  ;;  %v1550_v40 = vshrl.u32 %v2693_v30, 16 }
  0x63   :  { %2390 = vmatmul.mubr.msk.bf16.gmra.mrb[4].mxu1 %vm336_vm0, %v2795_v20  ;;  %v1500_v20 = vrot.slane %v1498_v55, 1  ;;  %v2697_v55 = vld [vmem:[%s3220_s0 + $0xa8] ss:$0 sps:$4 sm:$0x11]  }
  0x64   :  { %2393 = vmatprep.mubr.msk.bf16.mxu1 %vm336_vm0, %v2802_v24 }
  0x65   :  { %v1504_v24 = vor.u32 %v1502_v61, %v1500_v20  ;;  %v1501_v9 = vsel %vm165_vm1, %v1496_v0, %v1500_v20  ;;  %v1578_v61 = vshll.u32 %v2697_v55, 16 }
  0x66   :  { %2478 = vmatmul.mubr.msk.bf16.gmra.mrb[8].mxu0 %vm336_vm0, %v1469_v43  ;;  %v2695_v43 = vld [vmem:[%s3220_s0 + $0x98] sm:$0xff]  }
  0x67   :  { %2481 = vmatprep.mubr.msk.bf16.mxu0 %vm336_vm0, %v1477_v45  ;;  %v1509_v11 = vsel %vm165_vm1, %v1504_v24, %v1508_v2  ;;  %v1556_v45 = vrot.slane %v1554_v42, 1  ;;  %v1562_v48 = vshll.u32 %v2695_v43, 16  ;;  %v1566_v14 = vshrl.u32 %v2695_v43, 16 }
  0x68   :  { %v1580_v63 = vrot.slane %v1578_v61, 1 }
  0x69   :  { %v1560_v54 = vor.u32 %v1558_v49, %v1556_v45 }
  0x6b   :  { %2394 = vmatmul.mubr.msk.bf16.gmra.mrb[8].mxu1 %vm336_vm0, %v2816_v31  ;;  %v1516_v31 = vrot.slane %v1514_v6, 1  ;;  %v3166_v6 = vld [vmem:[%s3222_s2] ss:$0 sm:$0xff]  ;;  %s2722_s2 = smov [#allocation2]  }
  0x6c   :  { %2397 = vmatprep.mubr.msk.bf16.mxu1 %vm336_vm0, %v2829_v39  ;;  %s2093_s5 = sshll.u32 %s2722_s2, 4  ;;  %s2094_s5 = int_to_ptr.vmem [resolvable:$true] %s2093_s5 }
  0x6d   :  { %v1520_v39 = vor.u32 %v1518_v12, %v1516_v31  ;;  %v1517_v23 = vsel %vm165_vm1, %v1512_v17, %v1516_v31  ;;  %s2698_s6 = scalar_lea.vmem %s2094_s5, 5120  ;;  %p2703_p1 = scmp.lt.s32.totalorder %s2094_s5, %s2094_s5 }
  0x6e   :  { %2482 = vmatmul.mubr.msk.bf16.gmra.mrb[12].mxu0 %vm336_vm0, %v1485_v57  ;;  %v1572_v57 = vrot.slane %v1570_v53, 1  ;;  %p2699_p0 = scmp.ne.s32.totalorder %s2094_s5, %s2698_s6  ;;  %p2704_p2 = scmp.lt.s32.totalorder %s2698_s6, %s2698_s6 }
  0x6f   :  { %2485 = vmatprep.mubr.msk.bf16.mxu0 %vm336_vm0, %v1493_v60  ;;  %v1525_v27 = vsel %vm165_vm1, %v1520_v39, %v1524_v19  ;;  %v1574_v60 = vshrl.u32 %v2696_v47, 16 }
  0x70   :  { %p2705_p3 = por %p2704_p2, %p2703_p1 }
  0x71   :  { %v1576_v20 = vor.u32 %v1574_v60, %v1572_v57 }
  0x72   :  { %p2706_p4 = pnand %p2705_p3, %p2699_p0 }
  0x73   :  { %2398 = vmatmul.mubr.msk.bf16.gmra.mrb[12].mxu1 %vm336_vm0, %v2841_v46  ;;  %v1532_v46 = vrot.slane %v1530_v22, 1 }
  0x74   :  { %2401 = vmatprep.mubr.msk.bf16.mxu1 %vm336_vm0, %v2852_v51 }
  0x75   :  { %v1536_v51 = vor.u32 %v1534_v28, %v1532_v46  ;;  %v1533_v37 = vsel %vm165_vm1, %v1528_v32, %v1532_v46 }
  0x76   :  { %2486 = vmatmul.mubr.msk.bf16.gmra.mrb[16].mxu0 %vm336_vm0, %v1501_v9 }
  0x77   :  { %2489 = vmatprep.mubr.msk.bf16.mxu0 %vm336_vm0, %v1509_v11  ;;  %v1541_v38 = vsel %vm165_vm1, %v1536_v51, %v1540_v33 }
  0x7b   :  { %2402 = vmatmul.mubr.msk.bf16.gmra.mrb[16].mxu1 %vm336_vm0, %v2861_v56  ;;  %v1548_v56 = vrot.slane %v1546_v36, 1 }
  0x7c   :  { %2405 = vmatprep.mubr.msk.bf16.mxu1 %vm336_vm0, %v2878_v1 }
  0x7d   :  { %v1552_v1 = vor.u32 %v1550_v40, %v1548_v56  ;;  %v1549_v5 = vsel %vm165_vm1, %v1544_v44, %v1548_v56 }
  0x7e   :  { %2490 = vmatmul.mubr.msk.bf16.gmra.mrb[20].mxu0 %vm336_vm0, %v1517_v23 }
  0x7f   :  { %2493 = vmatprep.mubr.msk.bf16.mxu0 %vm336_vm0, %v1525_v27  ;;  %v1557_v52 = vsel %vm165_vm1, %v1552_v1, %v1556_v45 }
  0x83   :  { %2406 = vmatmul.mubr.msk.bf16.gmra.mrb[20].mxu1 %vm336_vm0, %v2887_v8  ;;  %v1564_v8 = vrot.slane %v1562_v48, 1 }
  0x84   :  { %2409 = vmatprep.mubr.msk.bf16.mxu1 %vm336_vm0, %v2904_v18 }
  0x85   :  { %v1568_v18 = vor.u32 %v1566_v14, %v1564_v8  ;;  %v1565_v59 = vsel %vm165_vm1, %v1560_v54, %v1564_v8 }
  0x86   :  { %2494 = vmatmul.mubr.msk.bf16.gmra.mrb[24].mxu0 %vm336_vm0, %v1533_v37 }
  0x87   :  { %2497 = vmatprep.mubr.msk.bf16.mxu0 %vm336_vm0, %v1541_v38  ;;  %v1573_v62 = vsel %vm165_vm1, %v1568_v18, %v1572_v57 }
  0x8b   :  { %2410 = vmatmul.mubr.msk.bf16.gmra.mrb[24].mxu1 %vm336_vm0, %v2913_v25  ;;  %v1581_v25 = vsel %vm165_vm1, %v1576_v20, %v1580_v63 }
  0x8c   :  { %2413 = vmatprep.mubr.msk.bf16.mxu1 %vm336_vm0, %v2930_v35 }
  0x8e   :  { %2498 = vmatmul.mubr.msk.bf16.gmra.mrb[28].mxu0 %vm336_vm0, %v1549_v5 }
  0x8f   :  { %2501 = vmatprep.mubr.msk.bf16.mxu0 %vm336_vm0, %v1557_v52 }
  0x93   :  { %2414 = vmatmul.mubr.msk.bf16.gmra.mrb[28].mxu1 %vm336_vm0, %v2939_v41 }
  0x94   :  { %2417 = vmatprep.mubr.msk.bf16.mxu1 %vm336_vm0, %v2955_v50 }
  0x96   :  { %2502 = vmatmul.mubr.msk.bf16.gmra.mrb[32].mxu0 %vm336_vm0, %v1565_v59 }
  0x97   :  { %2505 = vmatprep.mubr.msk.bf16.mxu0 %vm336_vm0, %v1573_v62 }
  0x9b   :  { %2418 = vmatmul.mubr.msk.bf16.gmra.mrb[32].mxu1 %vm336_vm0, %v2965_v58 }
  0x9c   :  { %2421 = vmatprep.mubr.msk.bf16.mxu1 %vm336_vm0, %v2984_v7 }
  0x9e   :  { %2506 = vmatmul.mubr.msk.bf16.gmra.mrb[36].mxu0 %vm336_vm0, %v1581_v25 }
  0xa3   :  { %2422 = vmatmul.mubr.msk.bf16.gmra.mrb[36].mxu1 %vm336_vm0, %v2997_v16 }
 0x129   :  { %v2471_v35 = vpop.f32.mrb[0].mxu0 }
 0x12a   :  { %v1682_v0 = vpop.f32.mrb[1].mxu0 }
 0x12b   :  { %v2472_v24 = vpop.f32.mrb[2].mxu0 }
 0x12c   :  { %v1685_v41 = vpop.f32.mrb[3].mxu0 }
 0x12e   :  { %v2387_v50 = vpop.f32.mrb[0].mxu1 }
 0x12f   :  { %v2509_v58 = vadd.f32 %v2471_v35, %v2387_v50  ;;  %v670_v10 = vpop.f32.mrb[1].mxu1 }
 0x130   :  { %v2510_v7 = vadd.f32 %v1682_v0, %v670_v10  ;;  %v2388_v12 = vpop.f32.mrb[2].mxu1 }
 0x131   :  { %v2475_v2 = vpop.f32.mrb[4].mxu0  ;;  %v1890_v16 = vadd.f32 %v2509_v58, %v3166_v6  ;;  %v2511_v13 = vadd.f32 %v2472_v24, %v2388_v12  ;;  %v673_v31 = vpop.f32.mrb[3].mxu1 }
 0x132   :  { %v1698_v3 = vpop.f32.mrb[5].mxu0  ;;  %v1888_v15 = vadd.f32 %v2510_v7, %v3166_v6  ;;  %v2512_v17 = vadd.f32 %v1685_v41, %v673_v31 }
 0x133   :  { %v2476_v9 = vpop.f32.mrb[6].mxu0  ;;  %vm1930_vm2 = vcmp.gt.f32.partialorder %v1890_v16, 0.0  ;;  %v1970_v39 = vmul.f32 0.2, %v1890_v16  ;;  %v1891_v19 = vadd.f32 %v2511_v13, %v3166_v6 }
 0x134   :  { %v1701_v11 = vpop.f32.mrb[7].mxu0  ;;  %vm1928_vm3 = vcmp.gt.f32.partialorder %v1888_v15, 0.0  ;;  %v1968_v21 = vmul.f32 0.2, %v1888_v15  ;;  %v1889_v22 = vadd.f32 %v2512_v17, %v3166_v6 }
 0x135   :  { %v2010_v26 = vsel %vm1930_vm2, %v1890_v16, %v1970_v39  ;;  %vm1931_vm4 = vcmp.gt.f32.partialorder %v1891_v19, 0.0  ;;  %v1971_v27 = vmul.f32 0.2, %v1891_v19 }
 0x136   :  { %2050 = vst [vmem:[#allocation2 + $0x10] sm:$0xff] %v2010_v26  ;;  %v2008_v29 = vsel %vm1928_vm3, %v1888_v15, %v1968_v21  ;;  %vm1929_vm5 = vcmp.gt.f32.partialorder %v1889_v22, 0.0  ;;  %v1969_v46 = vmul.f32 0.2, %v1889_v22  ;;  %v2391_v30 = vpop.f32.mrb[4].mxu1 }
 0x137   :  { %2048 = vst [vmem:[#allocation2] sm:$0xff] %v2008_v29  ;;  %v2011_v51 = vsel %vm1931_vm4, %v1891_v19, %v1971_v27  ;;  %v2513_v33 = vadd.f32 %v2475_v2, %v2391_v30  ;;  %v686_v34 = vpop.f32.mrb[5].mxu1 }
 0x138   :  { %2051 = vst [vmem:[#allocation2 + $0x18] sm:$0xff] %v2011_v51  ;;  %v2009_v37 = vsel %vm1929_vm5, %v1889_v22, %v1969_v46  ;;  %v2514_v4 = vadd.f32 %v1698_v3, %v686_v34  ;;  %v2392_v38 = vpop.f32.mrb[6].mxu1 }
 0x139   :  { %v2479_v23 = vpop.f32.mrb[8].mxu0  ;;  %2049 = vst [vmem:[#allocation2 + $0x8] sm:$0xff] %v2009_v37  ;;  %v1894_v40 = vadd.f32 %v2513_v33, %v3166_v6  ;;  %v2515_v42 = vadd.f32 %v2476_v9, %v2392_v38  ;;  %v689_v56 = vpop.f32.mrb[7].mxu1 }
 0x13a   :  { %v1714_v28 = vpop.f32.mrb[9].mxu0  ;;  %v1892_v43 = vadd.f32 %v2514_v4, %v3166_v6  ;;  %v2516_v44 = vadd.f32 %v1701_v11, %v689_v56 }
 0x13b   :  { %v2480_v32 = vpop.f32.mrb[10].mxu0  ;;  %vm1934_vm6 = vcmp.gt.f32.partialorder %v1894_v40, 0.0  ;;  %v1974_v1 = vmul.f32 0.2, %v1894_v40  ;;  %v1895_v45 = vadd.f32 %v2515_v42, %v3166_v6 }
 0x13c   :  { %v1717_v36 = vpop.f32.mrb[11].mxu0  ;;  %vm1932_vm7 = vcmp.gt.f32.partialorder %v1892_v43, 0.0  ;;  %v1972_v47 = vmul.f32 0.2, %v1892_v43  ;;  %v1893_v48 = vadd.f32 %v2516_v44, %v3166_v6 }
 0x13d   :  { %v2014_v49 = vsel %vm1934_vm6, %v1894_v40, %v1974_v1  ;;  %vm1935_vm8 = vcmp.gt.f32.partialorder %v1895_v45, 0.0  ;;  %v1975_v52 = vmul.f32 0.2, %v1895_v45 }
 0x13e   :  { %2054 = vst [vmem:[#allocation2 + $0x30] sm:$0xff] %v2014_v49  ;;  %v2012_v53 = vsel %vm1932_vm7, %v1892_v43, %v1972_v47  ;;  %vm1933_vm9 = vcmp.gt.f32.partialorder %v1893_v48, 0.0  ;;  %v1973_v8 = vmul.f32 0.2, %v1893_v48  ;;  %v2395_v54 = vpop.f32.mrb[8].mxu1 }
 0x13f   :  { %2052 = vst [vmem:[#allocation2 + $0x20] sm:$0xff] %v2012_v53  ;;  %v2015_v18 = vsel %vm1935_vm8, %v1895_v45, %v1975_v52  ;;  %v2517_v57 = vadd.f32 %v2479_v23, %v2395_v54  ;;  %v702_v59 = vpop.f32.mrb[9].mxu1 }
 0x140   :  { %2055 = vst [vmem:[#allocation2 + $0x38] sm:$0xff] %v2015_v18  ;;  %v2013_v61 = vsel %vm1933_vm9, %v1893_v48, %v1973_v8  ;;  %v2518_v62 = vadd.f32 %v1714_v28, %v702_v59  ;;  %v2396_v20 = vpop.f32.mrb[10].mxu1 }
 0x141   :  { %v2483_v5 = vpop.f32.mrb[12].mxu0  ;;  %2053 = vst [vmem:[#allocation2 + $0x28] sm:$0xff] %v2013_v61  ;;  %v1898_v63 = vadd.f32 %v2517_v57, %v3166_v6  ;;  %v2519_v25 = vadd.f32 %v2480_v32, %v2396_v20  ;;  %v705_v35 = vpop.f32.mrb[11].mxu1 }
 0x142   :  { %v1730_v14 = vpop.f32.mrb[13].mxu0  ;;  %v1896_v0 = vadd.f32 %v2518_v62, %v3166_v6  ;;  %v2520_v24 = vadd.f32 %v1717_v36, %v705_v35 }
 0x143   :  { %v2484_v55 = vpop.f32.mrb[14].mxu0  ;;  %vm1938_vm10 = vcmp.gt.f32.partialorder %v1898_v63, 0.0  ;;  %v1978_v41 = vmul.f32 0.2, %v1898_v63  ;;  %v1899_v2 = vadd.f32 %v2519_v25, %v3166_v6 }
 0x144   :  { %v1733_v60 = vpop.f32.mrb[15].mxu0  ;;  %vm1936_vm11 = vcmp.gt.f32.partialorder %v1896_v0, 0.0  ;;  %v1976_v3 = vmul.f32 0.2, %v1896_v0  ;;  %v1897_v50 = vadd.f32 %v2520_v24, %v3166_v6 }
 0x145   :  { %v2018_v58 = vsel %vm1938_vm10, %v1898_v63, %v1978_v41  ;;  %vm1939_vm12 = vcmp.gt.f32.partialorder %v1899_v2, 0.0  ;;  %v1979_v10 = vmul.f32 0.2, %v1899_v2 }
 0x146   :  { %2058 = vst [vmem:[#allocation2 + $0x50] sm:$0xff] %v2018_v58  ;;  %v2016_v7 = vsel %vm1936_vm11, %v1896_v0, %v1976_v3  ;;  %vm1937_vm13 = vcmp.gt.f32.partialorder %v1897_v50, 0.0  ;;  %v1977_v12 = vmul.f32 0.2, %v1897_v50  ;;  %v2399_v16 = vpop.f32.mrb[12].mxu1 }
 0x147   :  { %2056 = vst [vmem:[#allocation2 + $0x40] sm:$0xff] %v2016_v7  ;;  %v2019_v31 = vsel %vm1939_vm12, %v1899_v2, %v1979_v10  ;;  %v2521_v15 = vadd.f32 %v2483_v5, %v2399_v16  ;;  %v718_v17 = vpop.f32.mrb[13].mxu1 }
 0x148   :  { %2059 = vst [vmem:[#allocation2 + $0x58] sm:$0xff] %v2019_v31  ;;  %v2017_v19 = vsel %vm1937_vm13, %v1897_v50, %v1977_v12  ;;  %v2522_v21 = vadd.f32 %v1730_v14, %v718_v17  ;;  %v2400_v22 = vpop.f32.mrb[14].mxu1 }
 0x149   :  { %v2487_v9 = vpop.f32.mrb[16].mxu0  ;;  %2057 = vst [vmem:[#allocation2 + $0x48] sm:$0xff] %v2017_v19  ;;  %v1902_v23 = vadd.f32 %v2521_v15, %v3166_v6  ;;  %v2523_v26 = vadd.f32 %v2484_v55, %v2400_v22  ;;  %v721_v27 = vpop.f32.mrb[15].mxu1 }
 0x14a   :  { %v1746_v11 = vpop.f32.mrb[17].mxu0  ;;  %v1900_v28 = vadd.f32 %v2522_v21, %v3166_v6  ;;  %v2524_v29 = vadd.f32 %v1733_v60, %v721_v27 }
 0x14b   :  { %v2488_v13 = vpop.f32.mrb[18].mxu0  ;;  %vm1942_vm14 = vcmp.gt.f32.partialorder %v1902_v23, 0.0  ;;  %v1982_v46 = vmul.f32 0.2, %v1902_v23  ;;  %v1903_v30 = vadd.f32 %v2523_v26, %v3166_v6 }
 0x14c   :  { %v1749_v39 = vpop.f32.mrb[19].mxu0  ;;  %vm1940_vm15 = vcmp.gt.f32.partialorder %v1900_v28, 0.0  ;;  %v1980_v32 = vmul.f32 0.2, %v1900_v28  ;;  %v1901_v51 = vadd.f32 %v2524_v29, %v3166_v6 }
 0x14d   :  { %v2022_v34 = vsel %vm1942_vm14, %v1902_v23, %v1982_v46  ;;  %vm1943_vm0 = vcmp.gt.f32.partialorder %v1903_v30, 0.0  ;;  %v1983_v36 = vmul.f32 0.2, %v1903_v30 }
 0x14e   :  { %2062 = vst [vmem:[#allocation2 + $0x70] sm:$0xff] %v2022_v34  ;;  %v2020_v4 = vsel %vm1940_vm15, %v1900_v28, %v1980_v32  ;;  %vm1941_vm1 = vcmp.gt.f32.partialorder %v1901_v51, 0.0  ;;  %v1981_v38 = vmul.f32 0.2, %v1901_v51  ;;  %v2403_v40 = vpop.f32.mrb[16].mxu1 }
 0x14f   :  { %2060 = vst [vmem:[#allocation2 + $0x60] sm:$0xff] %v2020_v4  ;;  %v2023_v56 = vsel %vm1943_vm0, %v1903_v30, %v1983_v36  ;;  %v2525_v43 = vadd.f32 %v2487_v9, %v2403_v40  ;;  %v734_v44 = vpop.f32.mrb[17].mxu1 }
 0x150   :  { %2063 = vst [vmem:[#allocation2 + $0x78] sm:$0xff] %v2023_v56  ;;  %v2021_v45 = vsel %vm1941_vm1, %v1901_v51, %v1981_v38  ;;  %v2526_v47 = vadd.f32 %v1746_v11, %v734_v44  ;;  %v2404_v48 = vpop.f32.mrb[18].mxu1 }
 0x151   :  { %v2491_v33 = vpop.f32.mrb[20].mxu0  ;;  %2061 = vst [vmem:[#allocation2 + $0x68] sm:$0xff] %v2021_v45  ;;  %v1906_v5 = vadd.f32 %v2525_v43, %v3166_v6  ;;  %v2527_v49 = vadd.f32 %v2488_v13, %v2404_v48  ;;  %v737_v52 = vpop.f32.mrb[19].mxu1 }
 0x152   :  { %v1762_v37 = vpop.f32.mrb[21].mxu0  ;;  %v1904_v14 = vadd.f32 %v2526_v47, %v3166_v6  ;;  %v2528_v53 = vadd.f32 %v1749_v39, %v737_v52 }
 0x153   :  { %v2492_v42 = vpop.f32.mrb[22].mxu0  ;;  %vm1946_vm2 = vcmp.gt.f32.partialorder %v1906_v5, 0.0  ;;  %v1986_v8 = vmul.f32 0.2, %v1906_v5  ;;  %v1907_v54 = vadd.f32 %v2527_v49, %v3166_v6 }
 0x154   :  { %v1765_v1 = vpop.f32.mrb[23].mxu0  ;;  %vm1944_vm3 = vcmp.gt.f32.partialorder %v1904_v14, 0.0  ;;  %v1984_v55 = vmul.f32 0.2, %v1904_v14  ;;  %v1905_v18 = vadd.f32 %v2528_v53, %v3166_v6 }
 0x155   :  { %v2026_v59 = vsel %vm1946_vm2, %v1906_v5, %v1986_v8  ;;  %vm1947_vm4 = vcmp.gt.f32.partialorder %v1907_v54, 0.0  ;;  %v1987_v60 = vmul.f32 0.2, %v1907_v54 }
 0x156   :  { %2066 = vst [vmem:[#allocation2 + $0x90] sm:$0xff] %v2026_v59  ;;  %v2024_v62 = vsel %vm1944_vm3, %v1904_v14, %v1984_v55  ;;  %vm1945_vm5 = vcmp.gt.f32.partialorder %v1905_v18, 0.0  ;;  %v1985_v20 = vmul.f32 0.2, %v1905_v18  ;;  %v2407_v63 = vpop.f32.mrb[20].mxu1 }
 0x157   :  { %2064 = vst [vmem:[#allocation2 + $0x80] sm:$0xff] %v2024_v62  ;;  %v2027_v35 = vsel %vm1947_vm4, %v1907_v54, %v1987_v60  ;;  %v2529_v0 = vadd.f32 %v2491_v33, %v2407_v63  ;;  %v750_v24 = vpop.f32.mrb[21].mxu1 }
 0x158   :  { %2067 = vst [vmem:[#allocation2 + $0x98] sm:$0xff] %v2027_v35  ;;  %v2025_v2 = vsel %vm1945_vm5, %v1905_v18, %v1985_v20  ;;  %v2530_v3 = vadd.f32 %v1762_v37, %v750_v24  ;;  %v2408_v50 = vpop.f32.mrb[22].mxu1 }
 0x159   :  { %v2495_v57 = vpop.f32.mrb[24].mxu0  ;;  %2065 = vst [vmem:[#allocation2 + $0x88] sm:$0xff] %v2025_v2  ;;  %v1910_v9 = vadd.f32 %v2529_v0, %v3166_v6  ;;  %v2531_v58 = vadd.f32 %v2492_v42, %v2408_v50  ;;  %v753_v10 = vpop.f32.mrb[23].mxu1 }
 0x15a   :  { %v1778_v61 = vpop.f32.mrb[25].mxu0  ;;  %v1908_v11 = vadd.f32 %v2530_v3, %v3166_v6  ;;  %v2532_v7 = vadd.f32 %v1765_v1, %v753_v10 }
 0x15b   :  { %v2496_v25 = vpop.f32.mrb[26].mxu0  ;;  %vm1950_vm6 = vcmp.gt.f32.partialorder %v1910_v9, 0.0  ;;  %v1990_v12 = vmul.f32 0.2, %v1910_v9  ;;  %v1911_v16 = vadd.f32 %v2531_v58, %v3166_v6 }
 0x15c   :  { %v1781_v41 = vpop.f32.mrb[27].mxu0  ;;  %vm1948_vm7 = vcmp.gt.f32.partialorder %v1908_v11, 0.0  ;;  %v1988_v13 = vmul.f32 0.2, %v1908_v11  ;;  %v1909_v31 = vadd.f32 %v2532_v7, %v3166_v6 }
 0x15d   :  { %v2030_v17 = vsel %vm1950_vm6, %v1910_v9, %v1990_v12  ;;  %vm1951_vm8 = vcmp.gt.f32.partialorder %v1911_v16, 0.0  ;;  %v1991_v39 = vmul.f32 0.2, %v1911_v16 }
 0x15e   :  { %2070 = vst [vmem:[#allocation2 + $0xb0] sm:$0xff] %v2030_v17  ;;  %v2028_v21 = vsel %vm1948_vm7, %v1908_v11, %v1988_v13  ;;  %vm1949_vm9 = vcmp.gt.f32.partialorder %v1909_v31, 0.0  ;;  %v1989_v22 = vmul.f32 0.2, %v1909_v31  ;;  %v2411_v23 = vpop.f32.mrb[24].mxu1 }
 0x15f   :  { %2068 = vst [vmem:[#allocation2 + $0xa0] sm:$0xff] %v2028_v21  ;;  %v2031_v27 = vsel %vm1951_vm8, %v1911_v16, %v1991_v39  ;;  %v2533_v28 = vadd.f32 %v2495_v57, %v2411_v23  ;;  %v766_v29 = vpop.f32.mrb[25].mxu1 }
 0x160   :  { %2071 = vst [vmem:[#allocation2 + $0xb8] sm:$0xff] %v2031_v27  ;;  %v2029_v30 = vsel %vm1949_vm9, %v1909_v31, %v1989_v22  ;;  %v2534_v32 = vadd.f32 %v1778_v61, %v766_v29  ;;  %v2412_v51 = vpop.f32.mrb[26].mxu1 }
 0x161   :  { %v2499_v15 = vpop.f32.mrb[28].mxu0  ;;  %2069 = vst [vmem:[#allocation2 + $0xa8] sm:$0xff] %v2029_v30  ;;  %v1914_v33 = vadd.f32 %v2533_v28, %v3166_v6  ;;  %v2535_v34 = vadd.f32 %v2496_v25, %v2412_v51  ;;  %v769_v36 = vpop.f32.mrb[27].mxu1 }
 0x162   :  { %v1794_v19 = vpop.f32.mrb[29].mxu0  ;;  %v1912_v37 = vadd.f32 %v2534_v32, %v3166_v6  ;;  %v2536_v4 = vadd.f32 %v1781_v41, %v769_v36 }
 0x163   :  { %v2500_v26 = vpop.f32.mrb[30].mxu0  ;;  %vm1954_vm10 = vcmp.gt.f32.partialorder %v1914_v33, 0.0  ;;  %v1994_v38 = vmul.f32 0.2, %v1914_v33  ;;  %v1915_v40 = vadd.f32 %v2535_v34, %v3166_v6 }
 0x164   :  { %v1797_v46 = vpop.f32.mrb[31].mxu0  ;;  %vm1952_vm11 = vcmp.gt.f32.partialorder %v1912_v37, 0.0  ;;  %v1992_v42 = vmul.f32 0.2, %v1912_v37  ;;  %v1913_v56 = vadd.f32 %v2536_v4, %v3166_v6 }
 0x165   :  { %v2034_v44 = vsel %vm1954_vm10, %v1914_v33, %v1994_v38  ;;  %vm1955_vm12 = vcmp.gt.f32.partialorder %v1915_v40, 0.0  ;;  %v1995_v1 = vmul.f32 0.2, %v1915_v40 }
 0x166   :  { %2074 = vst [vmem:[#allocation2 + $0xd0] sm:$0xff] %v2034_v44  ;;  %v2032_v47 = vsel %vm1952_vm11, %v1912_v37, %v1992_v42  ;;  %vm1953_vm13 = vcmp.gt.f32.partialorder %v1913_v56, 0.0  ;;  %v1993_v48 = vmul.f32 0.2, %v1913_v56  ;;  %v2415_v5 = vpop.f32.mrb[28].mxu1 }
 0x167   :  { %2072 = vst [vmem:[#allocation2 + $0xc0] sm:$0xff] %v2032_v47  ;;  %v2035_v52 = vsel %vm1955_vm12, %v1915_v40, %v1995_v1  ;;  %v2537_v14 = vadd.f32 %v2499_v15, %v2415_v5  ;;  %v782_v53 = vpop.f32.mrb[29].mxu1 }
 0x168   :  { %2075 = vst [vmem:[#allocation2 + $0xd8] sm:$0xff] %v2035_v52  ;;  %v2033_v54 = vsel %vm1953_vm13, %v1913_v56, %v1993_v48  ;;  %v2538_v55 = vadd.f32 %v1794_v19, %v782_v53  ;;  %v2416_v18 = vpop.f32.mrb[30].mxu1 }
 0x169   :  { %v2503_v43 = vpop.f32.mrb[32].mxu0  ;;  %2073 = vst [vmem:[#allocation2 + $0xc8] sm:$0xff] %v2033_v54  ;;  %v1918_v57 = vadd.f32 %v2537_v14, %v3166_v6  ;;  %v2539_v59 = vadd.f32 %v2500_v26, %v2416_v18  ;;  %v785_v60 = vpop.f32.mrb[31].mxu1 }
 0x16a   :  { %v1810_v45 = vpop.f32.mrb[33].mxu0  ;;  %v1916_v61 = vadd.f32 %v2538_v55, %v3166_v6  ;;  %v2540_v62 = vadd.f32 %v1797_v46, %v785_v60 }
 0x16b   :  { %v2504_v49 = vpop.f32.mrb[34].mxu0  ;;  %vm1958_vm14 = vcmp.gt.f32.partialorder %v1918_v57, 0.0  ;;  %v1998_v20 = vmul.f32 0.2, %v1918_v57  ;;  %v1919_v63 = vadd.f32 %v2539_v59, %v3166_v6 }
 0x16c   :  { %v1813_v8 = vpop.f32.mrb[35].mxu0  ;;  %vm1956_vm15 = vcmp.gt.f32.partialorder %v1916_v61, 0.0  ;;  %v1996_v25 = vmul.f32 0.2, %v1916_v61  ;;  %v1917_v35 = vadd.f32 %v2540_v62, %v3166_v6 }
 0x16d   :  { %v2038_v24 = vsel %vm1958_vm14, %v1918_v57, %v1998_v20  ;;  %vm1959_vm0 = vcmp.gt.f32.partialorder %v1919_v63, 0.0  ;;  %v1999_v41 = vmul.f32 0.2, %v1919_v63 }
 0x16e   :  { %2078 = vst [vmem:[#allocation2 + $0xf0] sm:$0xff] %v2038_v24  ;;  %v2036_v3 = vsel %vm1956_vm15, %v1916_v61, %v1996_v25  ;;  %vm1957_vm1 = vcmp.gt.f32.partialorder %v1917_v35, 0.0  ;;  %v1997_v50 = vmul.f32 0.2, %v1917_v35  ;;  %v2419_v9 = vpop.f32.mrb[32].mxu1 }
 0x16f   :  { %2076 = vst [vmem:[#allocation2 + $0xe0] sm:$0xff] %v2036_v3  ;;  %v2039_v10 = vsel %vm1959_vm0, %v1919_v63, %v1999_v41  ;;  %v2541_v11 = vadd.f32 %v2503_v43, %v2419_v9  ;;  %v798_v7 = vpop.f32.mrb[33].mxu1 }
 0x170   :  { %2079 = vst [vmem:[#allocation2 + $0xf8] sm:$0xff] %v2039_v10  ;;  %v2037_v16 = vsel %vm1957_vm1, %v1917_v35, %v1997_v50  ;;  %v2542_v13 = vadd.f32 %v1810_v45, %v798_v7  ;;  %v2420_v31 = vpop.f32.mrb[34].mxu1 }
 0x171   :  { %v2507_v0 = vpop.f32.mrb[36].mxu0  ;;  %2077 = vst [vmem:[#allocation2 + $0xe8] sm:$0xff] %v2037_v16  ;;  %v1922_v15 = vadd.f32 %v2541_v11, %v3166_v6  ;;  %v2543_v17 = vadd.f32 %v2504_v49, %v2420_v31  ;;  %v801_v39 = vpop.f32.mrb[35].mxu1 }
 0x172   :  { %v1826_v2 = vpop.f32.mrb[37].mxu0  ;;  %v1920_v19 = vadd.f32 %v2542_v13, %v3166_v6  ;;  %v2544_v21 = vadd.f32 %v1813_v8, %v801_v39 }
 0x173   :  { %v2508_v58 = vpop.f32.mrb[38].mxu0  ;;  %vm1962_vm2 = vcmp.gt.f32.partialorder %v1922_v15, 0.0  ;;  %v2002_v22 = vmul.f32 0.2, %v1922_v15  ;;  %v1923_v23 = vadd.f32 %v2543_v17, %v3166_v6 }
 0x174   :  { %v1829_v12 = vpop.f32.mrb[39].mxu0  ;;  %vm1960_vm3 = vcmp.gt.f32.partialorder %v1920_v19, 0.0  ;;  %v2000_v26 = vmul.f32 0.2, %v1920_v19  ;;  %v1921_v27 = vadd.f32 %v2544_v21, %v3166_v6 }
 0x175   :  { %v2042_v28 = vsel %vm1962_vm2, %v1922_v15, %v2002_v22  ;;  %vm1963_vm4 = vcmp.gt.f32.partialorder %v1923_v23, 0.0  ;;  %v2003_v29 = vmul.f32 0.2, %v1923_v23 }
 0x176   :  { %2082 = vst [vmem:[#allocation2 + $0x110] sm:$0xff] %v2042_v28  ;;  %v2040_v46 = vsel %vm1960_vm3, %v1920_v19, %v2000_v26  ;;  %vm1961_vm5 = vcmp.gt.f32.partialorder %v1921_v27, 0.0  ;;  %v2001_v30 = vmul.f32 0.2, %v1921_v27  ;;  %v2423_v32 = vpop.f32.mrb[36].mxu1 }
 0x177   :  { %2080 = vst [vmem:[#allocation2 + $0x100] sm:$0xff] %v2040_v46  ;;  %v2043_v51 = vsel %vm1963_vm4, %v1923_v23, %v2003_v29  ;;  %v2545_v33 = vadd.f32 %v2507_v0, %v2423_v32  ;;  %v814_v34 = vpop.f32.mrb[37].mxu1 }
 0x178   :  { %2083 = vst [vmem:[#allocation2 + $0x118] sm:$0xff] %v2043_v51  ;;  %v2041_v36 = vsel %vm1961_vm5, %v1921_v27, %v2001_v30  ;;  %v2546_v37 = vadd.f32 %v1826_v2, %v814_v34  ;;  %v2424_v4 = vpop.f32.mrb[38].mxu1 }
 0x179   :  { %2081 = vst [vmem:[#allocation2 + $0x108] sm:$0xff] %v2041_v36  ;;  %v1926_v38 = vadd.f32 %v2545_v33, %v3166_v6  ;;  %v2547_v40 = vadd.f32 %v2508_v58, %v2424_v4  ;;  %v817_v42 = vpop.f32.mrb[39].mxu1 }
 0x17a   :  { %v1924_v56 = vadd.f32 %v2546_v37, %v3166_v6  ;;  %v2548_v43 = vadd.f32 %v1829_v12, %v817_v42 }
 0x17b   :  { %vm1966_vm6 = vcmp.gt.f32.partialorder %v1926_v38, 0.0  ;;  %v2006_v44 = vmul.f32 0.2, %v1926_v38  ;;  %v1927_v1 = vadd.f32 %v2547_v40, %v3166_v6 }
 0x17c   :  { %vm1964_vm7 = vcmp.gt.f32.partialorder %v1924_v56, 0.0  ;;  %v2004_v45 = vmul.f32 0.2, %v1924_v56  ;;  %v1925_v47 = vadd.f32 %v2548_v43, %v3166_v6 }
 0x17d   :  { %v2046_v48 = vsel %vm1966_vm6, %v1926_v38, %v2006_v44  ;;  %vm1967_vm8 = vcmp.gt.f32.partialorder %v1927_v1, 0.0  ;;  %v2007_v5 = vmul.f32 0.2, %v1927_v1 }
 0x17e   :  { %2086 = vst [vmem:[#allocation2 + $0x130] sm:$0xff] %v2046_v48  ;;  %v2044_v49 = vsel %vm1964_vm7, %v1924_v56, %v2004_v45  ;;  %vm1965_vm9 = vcmp.gt.f32.partialorder %v1925_v47, 0.0  ;;  %v2005_v52 = vmul.f32 0.2, %v1925_v47 }
 0x17f   :  { %2084 = vst [vmem:[#allocation2 + $0x120] sm:$0xff] %v2044_v49  ;;  %v2047_v14 = vsel %vm1967_vm8, %v1927_v1, %v2007_v5 }
 0x180   :  { %2087 = vst [vmem:[#allocation2 + $0x138] sm:$0xff] %v2047_v14  ;;  %v2045_v53 = vsel %vm1965_vm9, %v1925_v47, %v2005_v52 }
 0x181   :  { %2085 = vst [vmem:[#allocation2 + $0x128] sm:$0xff] %v2045_v53 }
 0x182   :  { %2709 = shalt.err (!%p2706_p4)
}
 0x183   :  { %s2710_s9 = scalar_lea.hbm %s3223_s3, 5120 }
 0x184   :  { %p2711_p5 = scmp.ne.s32.totalorder %s3223_s3, %s2710_s9  ;;  %p2714_p6 = scmp.lt.u32.totalorder %s2710_s9, %s3223_s3 }
 0x186   :  { %p2716_p7 = pnand %p2714_p6, %p2711_p5 }
 0x188   :  { %2719 = shalt.err (!%p2716_p7)
}
 0x189   :  { %s2723_s14 = smov 128   ;;  %s2724_s15 = smov 8  }
 0x18a   :  { %2099 = dma.vmem_to_hbm [thread:$0]  %s2094_s5, 5120, %s3223_s3, [#allocation3], %s2723_s14, %s2723_s14, %s2724_s15  }
 0x18b   :  { %2720 = dma.done.wait [#allocation3], 5120  }
 0x18c   :  { %2721 = vsyncadd [#allocation3], 4294962176 }
 0x18d   :  { %2103 = vsyncpa [#allocation3], 1 }

</bundles_post_ra>
